<compile_context>
chip_gen: v7x
topology: tpu7x:2x2x1
jax: 0.10.0
libtpu: 0.0.40
codegen_flags: <defaults>
</compile_context>

<pallas_src>
import functools

import jax
import jax.numpy as jnp
from jax.experimental import pallas as pl
from jax.experimental.pallas import tpu as pltpu


def _prev(x, k):
    """y[:, j] = x[:, j-k] (zero where j < k): value k lanes earlier."""
    tn, p = x.shape
    return jnp.concatenate([jnp.zeros((tn, k), x.dtype), x[:, :p - k]], axis=1)


def _next(x, k):
    """y[:, j] = x[:, j+k] (zero where j >= P-k): value k lanes later."""
    tn, p = x.shape
    return jnp.concatenate([x[:, k:], jnp.zeros((tn, k), x.dtype)], axis=1)


def _sobel_kernel(x_ref, m_ref, o_ref, *, w, eps):
    """x_ref / o_ref: (TN, P) tiles (one flattened image per row).

    m_ref: (2, P) f32 masks; row 0 zeroes image column 0 (left edge), row 1
    zeroes image column w-1 (right edge).
    """
    x = x_ref[...].astype(jnp.float32)

    ml = m_ref[0:1, :]                                    # (1, P), broadcasts over rows
    mr = m_ref[1:2, :]

    # Horizontal pass: zero-padded left / right neighbours via mask multiplies.
    x_l = _prev(x, 1) * ml                                # x[i, j-1]
    x_r = _next(x, 1) * mr                                # x[i, j+1]
    d = x_l - x_r                                         # x[i,j-1] - x[i,j+1]
    s = x_l + x_r + x + x                                 # x[i,j-1] + 2x[i,j] + x[i,j+1]

    # Vertical pass: +-1 image row == +-W lanes; zero fill == zero padding in H.
    D = _prev(d, w) + _next(d, w) + d + d                 # d[i-1] + 2d[i] + d[i+1]
    S = _prev(s, w) - _next(s, w)                         # s[i-1] - s[i+1]

    # gx = D/4, gy = S/4  ->  gx^2 + gy^2 = (D^2 + S^2) * 0.0625  (exact scale)
    o_ref[...] = jnp.sqrt((D * D + S * S) * 0.0625 + eps).astype(o_ref.dtype)


def _sublane_multiple(dtype):
    """Second-minor block multiple: 8 for f32, 16 for bf16, 32 for int8."""
    return max(8, 32 // jnp.dtype(dtype).itemsize)


def _rows_per_step(n, p, dtype, budget_bytes=3 * 1024 * 1024):
    """# of flattened images per grid step.

    Sized against the f32 intermediate footprint (p * 4 bytes per row,
    independent of the input dtype, since the body computes in f32), rounded
    to the dtype's sublane multiple, and capped so the grid keeps >=4 steps
    (>=2 for small n) for pipelining / v7x megacore whenever possible.
    """
    sub = _sublane_multiple(dtype)
    if n <= sub:
        return n                                          # single full-extent block
    tn = max(sub, (budget_bytes // (p * 4)) // sub * sub)
    target_steps = 4 if n >= 4 * sub else 2
    cap = pl.cdiv(pl.cdiv(n, target_steps), sub) * sub
    return max(sub, min(tn, cap, n))
    # TODO(synk): for huge single images (one flattened f32 row of several MiB)
    # add an H-tiling grid axis with a +-1-row halo so the minimum block still
    # fits VMEM instead of failing to compile.


def sobel_operator(x, epsilon=1e-6):
    """Pallas TPU SobelOperator.forward. x: (B, C, H, W) -> (B, C, H, W)."""
    b, c, h, w = x.shape
    n, p = b * c, h * w
    x2 = x.reshape(n, p)                                  # contiguous view, no data movement

    # Precomputed 0/1 edge masks for image columns 0 and w-1 (shape (2, P)).
    col = jnp.arange(p, dtype=jnp.int32) % w
    masks = jnp.stack([(col != 0).astype(jnp.float32),
                       (col != w - 1).astype(jnp.float32)])

    tn = _rows_per_step(n, p, x2.dtype)
    grid = (pl.cdiv(n, tn),)

    out = pl.pallas_call(
        functools.partial(_sobel_kernel, w=w, eps=float(epsilon)),
        out_shape=jax.ShapeDtypeStruct((n, p), x.dtype),
        grid=grid,
        in_specs=[pl.BlockSpec((tn, p), lambda i: (i, 0)),
                  pl.BlockSpec((2, p), lambda i: (0, 0))],
        out_specs=pl.BlockSpec((tn, p), lambda i: (i, 0)),
        compiler_params=pltpu.CompilerParams(
            dimension_semantics=("parallel",),
            vmem_limit_bytes=48 * 1024 * 1024),
    )(x2, masks)
    return out.reshape(b, c, h, w)


def _reference_sobel(x, epsilon=1e-6):
    """Pure-jnp reference (explicit zero pad + 3x3 taps), exact f32 math."""
    b, c, h, w = x.shape
    xp = jnp.pad(x.astype(jnp.float32), ((0, 0), (0, 0), (1, 1), (1, 1)))
    x00 = xp[:, :, 0:h,     0:w]
    x01 = xp[:, :, 0:h,     1:w + 1]
    x02 = xp[:, :, 0:h,     2:w + 2]
    x10 = xp[:, :, 1:h + 1, 0:w]
    x12 = xp[:, :, 1:h + 1, 2:w + 2]
    x20 = xp[:, :, 2:h + 2, 0:w]
    x21 = xp[:, :, 2:h + 2, 1:w + 1]
    x22 = xp[:, :, 2:h + 2, 2:w + 2]
    gx = (x00 - x02 + 2.0 * x10 - 2.0 * x12 + x20 - x22) * 0.25
    gy = (x00 + 2.0 * x01 + x02 - x20 - 2.0 * x21 - x22) * 0.25
    return jnp.sqrt(gx * gx + gy * gy + epsilon).astype(x.dtype)


if __name__ == "__main__":
    key = jax.random.PRNGKey(0)
    x = jax.random.normal(key, (2, 4, 16, 16), dtype=jnp.float32)

    out = jax.block_until_ready(sobel_operator(x))
    ref = jax.block_until_ready(_reference_sobel(x))

    assert out.shape == (2, 4, 16, 16), out.shape
    max_err = float(jnp.max(jnp.abs(out - ref)))
    assert jnp.allclose(out, ref, atol=1e-5, rtol=1e-5), max_err
    print("KERNEL_OK")
</pallas_src>

<mosaic_0001>
module attributes {stable_mosaic.version = 11 : i64} {
  func.func @_sobel_kernel(%arg0: i32, %arg1: memref<8x256xf32, #tpu.memory_space<vmem>>, %arg2: memref<2x256xf32, #tpu.memory_space<vmem>>, %arg3: memref<8x256xf32, #tpu.memory_space<vmem>>) attributes {dimension_semantics = [#tpu.dimension_semantics<parallel>], iteration_bounds = array<i64: 1>, scalar_prefetch = 0 : i64, scratch_operands = 0 : i64, tpu.core_type = #tpu.core_type<tc>, window_params = [{transform_indices = @transform_0, window_bounds = array<i64: 8, 256>}, {pipeline_mode = #tpu.pipeline_mode<synchronous>, transform_indices = @transform_1, window_bounds = array<i64: 2, 256>}, {transform_indices = @transform_2, window_bounds = array<i64: 8, 256>}]} {
    %c0 = arith.constant 0 : index
    %c0_0 = arith.constant 0 : index
    %0 = vector.load %arg1[%c0, %c0_0] : memref<8x256xf32, #tpu.memory_space<vmem>>, vector<8x256xf32>
    %c0_1 = arith.constant 0 : index
    %c0_2 = arith.constant 0 : index
    %1 = vector.load %arg2[%c0_1, %c0_2] : memref<2x256xf32, #tpu.memory_space<vmem>>, vector<1x256xf32>
    %c1 = arith.constant 1 : index
    %c0_3 = arith.constant 0 : index
    %2 = vector.load %arg2[%c1, %c0_3] : memref<2x256xf32, #tpu.memory_space<vmem>>, vector<1x256xf32>
    %cst = arith.constant 0.000000e+00 : f32
    %3 = vector.broadcast %cst : f32 to vector<8x1xf32>
    %4 = vector.extract_strided_slice %0 {offsets = [0, 0], sizes = [8, 255], strides = [1, 1]} : vector<8x256xf32> to vector<8x255xf32>
    %5 = tpu.concatenate %3, %4 in 1 : vector<8x1xf32>, vector<8x255xf32> -> vector<8x256xf32>
    %6 = vector.broadcast %1 : vector<1x256xf32> to vector<8x256xf32>
    %7 = arith.mulf %5, %6 : vector<8x256xf32>
    %8 = vector.extract_strided_slice %0 {offsets = [0, 1], sizes = [8, 255], strides = [1, 1]} : vector<8x256xf32> to vector<8x255xf32>
    %cst_4 = arith.constant 0.000000e+00 : f32
    %9 = vector.broadcast %cst_4 : f32 to vector<8x1xf32>
    %10 = tpu.concatenate %8, %9 in 1 : vector<8x255xf32>, vector<8x1xf32> -> vector<8x256xf32>
    %11 = vector.broadcast %2 : vector<1x256xf32> to vector<8x256xf32>
    %12 = arith.mulf %10, %11 : vector<8x256xf32>
    %13 = arith.subf %7, %12 : vector<8x256xf32>
    %14 = arith.addf %7, %12 : vector<8x256xf32>
    %15 = arith.addf %14, %0 : vector<8x256xf32>
    %16 = arith.addf %15, %0 : vector<8x256xf32>
    %cst_5 = arith.constant 0.000000e+00 : f32
    %17 = vector.broadcast %cst_5 : f32 to vector<8x16xf32>
    %18 = vector.extract_strided_slice %13 {offsets = [0, 0], sizes = [8, 240], strides = [1, 1]} : vector<8x256xf32> to vector<8x240xf32>
    %19 = tpu.concatenate %17, %18 in 1 : vector<8x16xf32>, vector<8x240xf32> -> vector<8x256xf32>
    %20 = vector.extract_strided_slice %13 {offsets = [0, 16], sizes = [8, 240], strides = [1, 1]} : vector<8x256xf32> to vector<8x240xf32>
    %cst_6 = arith.constant 0.000000e+00 : f32
    %21 = vector.broadcast %cst_6 : f32 to vector<8x16xf32>
    %22 = tpu.concatenate %20, %21 in 1 : vector<8x240xf32>, vector<8x16xf32> -> vector<8x256xf32>
    %23 = arith.addf %19, %22 : vector<8x256xf32>
    %24 = arith.addf %23, %13 : vector<8x256xf32>
    %25 = arith.addf %24, %13 : vector<8x256xf32>
    %cst_7 = arith.constant 0.000000e+00 : f32
    %26 = vector.broadcast %cst_7 : f32 to vector<8x16xf32>
    %27 = vector.extract_strided_slice %16 {offsets = [0, 0], sizes = [8, 240], strides = [1, 1]} : vector<8x256xf32> to vector<8x240xf32>
    %28 = tpu.concatenate %26, %27 in 1 : vector<8x16xf32>, vector<8x240xf32> -> vector<8x256xf32>
    %29 = vector.extract_strided_slice %16 {offsets = [0, 16], sizes = [8, 240], strides = [1, 1]} : vector<8x256xf32> to vector<8x240xf32>
    %cst_8 = arith.constant 0.000000e+00 : f32
    %30 = vector.broadcast %cst_8 : f32 to vector<8x16xf32>
    %31 = tpu.concatenate %29, %30 in 1 : vector<8x240xf32>, vector<8x16xf32> -> vector<8x256xf32>
    %32 = arith.subf %28, %31 : vector<8x256xf32>
    %33 = arith.mulf %25, %25 : vector<8x256xf32>
    %34 = arith.mulf %32, %32 : vector<8x256xf32>
    %35 = arith.addf %33, %34 : vector<8x256xf32>
    %cst_9 = arith.constant 6.250000e-02 : f32
    %36 = vector.broadcast %cst_9 : f32 to vector<8x256xf32>
    %37 = arith.mulf %35, %36 : vector<8x256xf32>
    %cst_10 = arith.constant 9.99999997E-7 : f32
    %38 = vector.broadcast %cst_10 : f32 to vector<8x256xf32>
    %39 = arith.addf %37, %38 : vector<8x256xf32>
    %40 = math.sqrt %39 : vector<8x256xf32>
    %c0_11 = arith.constant 0 : index
    %c0_12 = arith.constant 0 : index
    %41 = vector.load %arg3[%c0_11, %c0_12] : memref<8x256xf32, #tpu.memory_space<vmem>>, vector<8x256xf32>
    tpu.vector_store %arg3[%c0_11, %c0_12], %40 {strides = array<i32>} : memref<8x256xf32, #tpu.memory_space<vmem>>, vector<8x256xf32>,
    return
  }
  func.func @transform_0(%arg0: i32) -> (i32, i32) {
    %c0_i32 = arith.constant 0 : i32
    %c0_i32_0 = arith.constant 0 : i32
    return %arg0, %c0_i32 : i32, i32
  }
  func.func @transform_1(%arg0: i32) -> (i32, i32) {
    %c0_i32 = arith.constant 0 : i32
    %c0_i32_0 = arith.constant 0 : i32
    %c0_i32_1 = arith.constant 0 : i32
    return %c0_i32, %c0_i32_0 : i32, i32
  }
  func.func @transform_2(%arg0: i32) -> (i32, i32) {
    %c0_i32 = arith.constant 0 : i32
    %c0_i32_0 = arith.constant 0 : i32
    return %arg0, %c0_i32 : i32, i32
  }
}

</mosaic_0001>

<bundles_post_ra>
// kernel: tpu_custom_call.1
= control target key start
LH: loop header
LB: loop body
LE: loop exit
PB: predicated region body
PF: predicated region fallthrough
CT: control target
= control target key end

     0   :  { %7 = vsyncpa [#allocation3], 0  ;;  %s332_s0 = inlined_call_operand.hbm [shape: f32[8,256], index: 0, kind: input, shape index: {}]   ;;  %s333_s1 = inlined_call_operand.hbm [shape: f32[2,256], index: 1, kind: input, shape index: {}]   ;;  %s334_s2 = inlined_call_operand.hbm [shape: f32[8,256], index: 2, kind: output, shape index: {}]  }
   0x1   :  { %8 = vsyncpa [#allocation6], 0 }
   0x2   :  { %9 = vsyncpa [#allocation4], 0  ;;  %s266_s9 = smov [#allocation2]   ;;  %s267_s11 = smov [#allocation5]  }
   0x3   :  { %s16_s10 = sshll.u32 %s266_s9, 4  ;;  %s26_s12 = sshll.u32 %s267_s11, 4  ;;  %s17_s10 = int_to_ptr.vmem [resolvable:$true] %s16_s10  ;;  %s27_s12 = int_to_ptr.vmem [resolvable:$true] %s26_s12 }
   0x4   :  { %s194_s15 = scalar_lea.hbm %s332_s0, 256 }
   0x5   :  { %p195_p0 = scmp.ne.s32.totalorder %s332_s0, %s194_s15  ;;  %p198_p1 = scmp.lt.u32.totalorder %s194_s15, %s332_s0 }
   0x7   :  { %p200_p2 = pnand %p198_p1, %p195_p0 }
   0x9   :  { %203 = shalt.err (!%p200_p2)
}
   0xa   :  { %s204_s20 = scalar_lea.vmem %s17_s10, 256  ;;  %p209_p4 = scmp.lt.s32.totalorder %s17_s10, %s17_s10 }
   0xb   :  { %p205_p3 = scmp.ne.s32.totalorder %s17_s10, %s204_s20  ;;  %p210_p5 = scmp.lt.s32.totalorder %s204_s20, %s204_s20 }
   0xd   :  { %p211_p6 = por %p210_p5, %p209_p4 }
   0xf   :  { %p212_p7 = pnand %p211_p6, %p205_p3 }
  0x11   :  { %215 = shalt.err (!%p212_p7)
}
  0x12   :  { %19 = dma.hbm_to_vmem [thread:$0]  %s332_s0, 256, %s17_s10, [#allocation3]  }
  0x13   :  { %s216_s25 = scalar_lea.hbm %s333_s1, 64 }
  0x14   :  { %p217_p8 = scmp.ne.s32.totalorder %s333_s1, %s216_s25  ;;  %p220_p9 = scmp.lt.u32.totalorder %s216_s25, %s333_s1 }
  0x16   :  { %p222_p10 = pnand %p220_p9, %p217_p8 }
  0x18   :  { %225 = shalt.err (!%p222_p10)
}
  0x19   :  { %s226_s30 = scalar_lea.vmem %s27_s12, 64  ;;  %p231_p12 = scmp.lt.s32.totalorder %s27_s12, %s27_s12 }
  0x1a   :  { %p227_p11 = scmp.ne.s32.totalorder %s27_s12, %s226_s30  ;;  %p232_p13 = scmp.lt.s32.totalorder %s226_s30, %s226_s30 }
  0x1c   :  { %p233_p0 = por %p232_p13, %p231_p12 }
  0x1e   :  { %p234_p1 = pnand %p233_p0, %p227_p11 }
  0x20   :  { %237 = shalt.err (!%p234_p1)
}
  0x21   :  { %29 = dma.hbm_to_vmem [thread:$0]  %s333_s1, 64, %s27_s12, [#allocation6]  }
  0x22   :  { %260 = dma.done.wait [#allocation3], 256  }
  0x23   :  { %261 = vsyncadd [#allocation3], 4294967040 }
  0x24   :  { %262 = dma.done.wait [#allocation6], 64  }
  0x25   :  { %263 = vsyncadd [#allocation6], 4294967232  ;;  %v36_v0 = vld [vmem:[#allocation2] sm:$0xff]  ;;  %s268_s4 = smov 127   ;;  %s269_s5 = smov 1   ;;  %v37_v1 = vld [vmem:[#allocation2 + $0x8] sm:$0xff]  ;;  %v53_v2 = vlaneseq }
  0x26   :  { %65 = vrot.lane.b32.xlu1 %v36_v0, %s268_s4  ;;  %43 = vrot.lane.b32.xlu0 %v36_v0, %s269_s5  ;;  %v38_v6 = vld [vmem:[#allocation5] ss:$2 sm:$0x3]  ;;  %v40_v7 = vld [vmem:[#allocation5 + $0x1] ss:$2 sm:$0x3] }
  0x27   :  { %v54_v3 = vshrl.u32 %v53_v2, 7  ;;  %vm47_vm0 = vcmask 7168   ;;  %vm69_vm1 = vcmask 1039360   ;;  %s270_s1 = smov 16   ;;  %s271_s6 = smov 112   ;;  %vm101_vm2 = vcmask 130048  }
  0x28   :  { %vm110_vm3 = vcmask 916480   ;;  %s272_s7 = smov [#allocation7]  }
  0x29   :  { %v55_v4 = vsub.s32 0, %v54_v3  ;;  %v59_v5 = vsub.s32 1, %v54_v3  ;;  %s173_s8 = sshll.u32 %s272_s7, 4  ;;  %s174_s8 = int_to_ptr.vmem [resolvable:$true] %s173_s8 }
  0x2a   :  { %67 = vrot.lane.b32.xlu1 %v37_v1, %s268_s4  ;;  %45 = vrot.lane.b32.xlu0 %v37_v1, %s269_s5  ;;  %s238_s9 = scalar_lea.vmem %s174_s8, 256  ;;  %p243_p3 = scmp.lt.s32.totalorder %s174_s8, %s174_s8 }
  0x2b   :  { %v56_v10 = vrot.slane %v38_v6, %v55_v4  ;;  %v78_v11 = vrot.slane %v40_v7, %v55_v4  ;;  %v82_v12 = vrot.slane %v40_v7, %v59_v5  ;;  %v60_v13 = vrot.slane %v38_v6, %v59_v5  ;;  %p239_p2 = scmp.ne.s32.totalorder %s174_s8, %s238_s9  ;;  %p244_p4 = scmp.lt.s32.totalorder %s238_s9, %s238_s9 }
  0x2d   :  { %p245_p5 = por %p244_p4, %p243_p3 }
  0x2f   :  { %p246_p6 = pnand %p245_p5, %p239_p2 }
  0x98   :  { %v66_v8 = vpop.permute.xlu1 %65  ;;  %v44_v9 = vpop.permute.xlu0 %43 }
  0x99   :  { %v51_v14 = vsel %vm47_vm0, 0.0, %v44_v9 }
  0x9a   :  { %v63_v20 = vmul.f32 %v56_v10, %v51_v14 }
  0x9c   :  { %v68_v15 = vpop.permute.xlu1 %67  ;;  %v46_v16 = vpop.permute.xlu0 %45 }
  0x9d   :  { %v70_v17 = vsel %vm69_vm1, %v66_v8, %v68_v15  ;;  %v73_v18 = vsel %vm69_vm1, %v68_v15, 0.0  ;;  %v48_v19 = vsel %vm47_vm0, %v44_v9, %v46_v16 }
  0x9e   :  { %v85_v21 = vmul.f32 %v78_v11, %v70_v17  ;;  %v86_v22 = vmul.f32 %v82_v12, %v73_v18  ;;  %v64_v23 = vmul.f32 %v60_v13, %v48_v19 }
  0xa0   :  { %v87_v24 = vsub.f32 %v63_v20, %v85_v21  ;;  %v89_v25 = vadd.f32 %v85_v21, %v63_v20  ;;  %v88_v26 = vsub.f32 %v64_v23, %v86_v22  ;;  %v90_v27 = vadd.f32 %v86_v22, %v64_v23 }
  0xa2   :  { %97 = vrot.lane.b32.xlu0 %v87_v24, %s270_s1  ;;  %99 = vrot.lane.b32.xlu1 %v88_v26, %s270_s1  ;;  %v91_v28 = vadd.f32 %v89_v25, %v36_v0  ;;  %v92_v29 = vadd.f32 %v90_v27, %v37_v1 }
  0xa4   :  { %v93_v30 = vadd.f32 %v91_v28, %v36_v0  ;;  %v94_v31 = vadd.f32 %v92_v29, %v37_v1 }
  0xa6   :  { %106 = vrot.lane.b32.xlu0 %v87_v24, %s271_s6  ;;  %108 = vrot.lane.b32.xlu1 %v88_v26, %s271_s6 }
  0xaa   :  { %123 = vrot.lane.b32.xlu0 %v93_v30, %s270_s1  ;;  %125 = vrot.lane.b32.xlu1 %v94_v31, %s270_s1 }
  0xae   :  { %131 = vrot.lane.b32.xlu0 %v93_v30, %s271_s6  ;;  %133 = vrot.lane.b32.xlu1 %v94_v31, %s271_s6 }
 0x114   :  { %v100_v32 = vpop.permute.xlu1 %99  ;;  %v98_v33 = vpop.permute.xlu0 %97 }
 0x115   :  { %v102_v36 = vsel %vm101_vm2, %v98_v33, %v100_v32  ;;  %v105_v37 = vsel %vm101_vm2, 0.0, %v98_v33 }
 0x118   :  { %v109_v34 = vpop.permute.xlu1 %108  ;;  %v107_v35 = vpop.permute.xlu0 %106 }
 0x119   :  { %v114_v38 = vsel %vm110_vm3, %v109_v34, 0.0  ;;  %v111_v39 = vsel %vm110_vm3, %v107_v35, %v109_v34 }
 0x11a   :  { %v116_v40 = vadd.f32 %v114_v38, %v102_v36  ;;  %v115_v41 = vadd.f32 %v111_v39, %v105_v37 }
 0x11c   :  { %v118_v42 = vadd.f32 %v116_v40, %v88_v26  ;;  %v117_v43 = vadd.f32 %v115_v41, %v87_v24  ;;  %v126_v44 = vpop.permute.xlu1 %125  ;;  %v124_v45 = vpop.permute.xlu0 %123 }
 0x11d   :  { %v127_v50 = vsel %vm101_vm2, %v124_v45, %v126_v44  ;;  %v130_v51 = vsel %vm101_vm2, 0.0, %v124_v45 }
 0x11e   :  { %v119_v46 = vadd.f32 %v117_v43, %v87_v24  ;;  %v120_v48 = vadd.f32 %v118_v42, %v88_v26 }
 0x120   :  { %v134_v47 = vpop.permute.xlu1 %133  ;;  %v132_v49 = vpop.permute.xlu0 %131  ;;  %v142_v56 = vmul.f32 %v120_v48, %v120_v48  ;;  %v141_v58 = vmul.f32 %v119_v46, %v119_v46 }
 0x121   :  { %v138_v52 = vsel %vm110_vm3, %v134_v47, 0.0  ;;  %v135_v53 = vsel %vm110_vm3, %v132_v49, %v134_v47 }
 0x122   :  { %v140_v54 = vsub.f32 %v127_v50, %v138_v52  ;;  %v139_v55 = vsub.f32 %v130_v51, %v135_v53 }
 0x124   :  { %v144_v57 = vmul.f32 %v140_v54, %v140_v54  ;;  %v143_v59 = vmul.f32 %v139_v55, %v139_v55 }
 0x126   :  { %v146_v60 = vadd.f32 %v144_v57, %v142_v56  ;;  %v145_v61 = vadd.f32 %v143_v59, %v141_v58 }
 0x128   :  { %v148_v62 = vmul.f32 0.0625, %v146_v60  ;;  %v147_v63 = vmul.f32 0.0625, %v145_v61 }
 0x12a   :  { %v150_v0 = vadd.f32 1e-06, %v148_v62  ;;  %v149_v1 = vadd.f32 1e-06, %v147_v63 }
 0x12c   :  { %190 = vrsqrt.f32 %v149_v1  ;;  %vm153_vm4 = vcmp.eq.f32.partialorder %v149_v1, inf  ;;  %v156_v5 = vand.u32 2147483648, %v149_v1  ;;  %vm155_vm5 = vcmp.eq.f32.partialorder %v149_v1, 0.0 }
 0x12d   :  { %192 = vrsqrt.f32 %v150_v0  ;;  %vm160_vm6 = vcmp.eq.f32.partialorder %v150_v0, inf  ;;  %v163_v8 = vand.u32 2147483648, %v150_v0  ;;  %vm162_vm7 = vcmp.eq.f32.partialorder %v150_v0, 0.0 }
 0x136   :  { %v191_v2 = vpop.eup %190 }
 0x137   :  { %v193_v3 = vpop.eup %192  ;;  %v152_v4 = vmul.f32 %v191_v2, %v149_v1 }
 0x138   :  { %v159_v6 = vmul.f32 %v193_v3, %v150_v0 }
 0x139   :  { %v154_v7 = vsel %vm153_vm4, %v149_v1, %v152_v4 }
 0x13a   :  { %v157_v9 = vsel %vm155_vm5, %v156_v5, %v154_v7  ;;  %v161_v10 = vsel %vm160_vm6, %v150_v0, %v159_v6 }
 0x13b   :  { %v164_v11 = vsel %vm162_vm7, %v163_v8, %v161_v10  ;;  %165 = vst [vmem:[#allocation7] sm:$0xff] %v157_v9 }
 0x13c   :  { %166 = vst [vmem:[#allocation7 + $0x8] sm:$0xff] %v164_v11 }
 0x13d   :  { %249 = shalt.err (!%p246_p6)
}
 0x13e   :  { %s250_s12 = scalar_lea.hbm %s334_s2, 256 }
 0x13f   :  { %p251_p7 = scmp.ne.s32.totalorder %s334_s2, %s250_s12  ;;  %p254_p8 = scmp.lt.u32.totalorder %s250_s12, %s334_s2 }
 0x141   :  { %p256_p9 = pnand %p254_p8, %p251_p7 }
 0x143   :  { %259 = shalt.err (!%p256_p9)
}
 0x144   :  { %176 = dma.vmem_to_hbm [thread:$0]  %s174_s8, 256, %s334_s2, [#allocation4]  }
 0x145   :  { %264 = dma.done.wait [#allocation4], 256  }
 0x146   :  { %265 = vsyncadd [#allocation4], 4294967040 }
 0x147   :  { %180 = vsyncpa [#allocation3], 1 }
 0x148   :  { %181 = vsyncpa [#allocation6], 1 }
 0x149   :  { %182 = vsyncpa [#allocation4], 1 }

</bundles_post_ra>
